<compile_context>
chip_gen: v6e
topology: v6e:2x2x1
jax: 0.10.0
libtpu: 0.0.40
codegen_flags: <defaults>
</compile_context>

<pallas_src>
import numpy as np

import jax
import jax.numpy as jnp
from jax.experimental import pallas as pl
from jax.experimental.pallas import tpu as pltpu


# ---------------------------------------------------------------------------
# Trace-time weight transforms (weight-side, zero runtime cost)
# ---------------------------------------------------------------------------

def _row_pair_conv_matrix(w_t, in_w):
    """ConvTranspose2d(k=4, s=2, p=1, bias=False) as one GEMM per input row.

    The GEMM input (per image) is A of shape (H, 3*(W+2)*Cin): row i is the
    lane-concatenation of zero-padded NHWC input rows (i-1, i, i+1), lanes
    ordered (padded_col, cin).  The returned matrix M has shape
    (3*(W+2)*Cin, 2*(2W)*Cout) so that (A @ M)[i] is the contiguous NHWC slab
    of output rows (2i, 2i+1): lanes ordered (row_parity, out_col, cout).
    The 2x2 phase interleave of the transposed conv is therefore absorbed into
    the GEMM column order.  Specialised to kernel=4, stride=2, padding=1.
    """
    cin, cout, kh, kw = w_t.shape
    assert kh == 4 and kw == 4, "row-pair decomposition is specialised to k=4,s=2,p=1"
    W = in_w
    # S[m, ry, h] == 1 iff padded-row offset m (0..2) feeds output-row parity ry
    # through kernel row h (h = 3 - 2a - ry, a = m - ry in {0,1}).
    S = np.zeros((3, 2, 4), np.float32)
    for ry in range(2):
        for a in range(2):
            S[ry + a, ry, 3 - 2 * a - ry] = 1.0
    # T[jp, q, w] == 1 iff padded input column jp feeds output column q = 2j+rx
    # through kernel column w (w = 3 - 2c - rx, c = jp - j - rx in {0,1}).
    T = np.zeros((W + 2, 2 * W, 4), np.float32)
    for j in range(W):
        for rx in range(2):
            for c in range(2):
                T[j + rx + c, 2 * j + rx, 3 - 2 * c - rx] = 1.0
    m = jnp.einsum("mrh,pqw,iohw->mpirqo", jnp.asarray(S), jnp.asarray(T), w_t)
    return m.reshape(3 * (W + 2) * cin, 2 * (2 * W) * cout)


# ---------------------------------------------------------------------------
# Fused decoder kernel (single pallas_call, grid=())
# ---------------------------------------------------------------------------

def _build_kernel(batch, h0, w0, c0, layer_dims, acts):
    """layer_dims: [(H, W, Cin, Cout), ...] per ConvT layer; acts: 'relu'/'sigmoid'."""
    n_layers = len(layer_dims)

    def kernel(*refs):
        z_ref, w1_ref, b1_ref, w2_ref, b2_ref = refs[:5]
        conv_refs = refs[5:5 + 3 * n_layers]
        o_ref = refs[5 + 3 * n_layers]
        pad_refs = refs[5 + 3 * n_layers + 1:]

        # Zero every padded-activation scratch once (borders must stay zero).
        for pr in pad_refs:
            pr[...] = jnp.zeros(pr.shape, pr.dtype)

        # ---- Linear -> ReLU -> Linear -> ReLU (both matmuls on the MXU) ----
        h = jnp.dot(z_ref[...], w1_ref[...], preferred_element_type=jnp.float32)
        h = jnp.maximum(h + b1_ref[...], 0.0)
        p = jnp.dot(h, w2_ref[...], preferred_element_type=jnp.float32)
        p = jnp.maximum(p + b2_ref[...], 0.0)          # (B, h0*w0*c0), NHWC cols
        # Unflatten2D is a free view (NCHW->NHWC permute already folded into w2
        # columns); the extra ReLU after it is idempotent.  Scatter the MLP
        # output into layer 0's zero-padded NHWC VMEM scratch.
        row_w = w0 * c0
        pad0 = pad_refs[0]
        for b in range(batch):
            for r in range(h0):
                pad0[b, 1 + r:2 + r, c0:c0 + row_w] = p[b:b + 1, r * row_w:(r + 1) * row_w]

        # ---- ConvTranspose2d (+BN) (+act) stack, fully VMEM resident ----
        for l, (H, W, Cin, Cout) in enumerate(layer_dims):
            w_ref, sc_ref, sh_ref = conv_refs[3 * l:3 * l + 3]
            x_pad = pad_refs[l]
            wmat = w_ref[...]               # (3*(W+2)*Cin, 4*W*Cout)
            scale = sc_ref[...]             # (1, 4*W*Cout) per-channel BN scale (tiled)
            shift = sh_ref[...]
            half = (2 * W) * Cout           # lanes of one output row
            for b in range(batch):
                # A row i = padded rows (i-1, i, i+1): in-VMEM "im2col".
                a_mat = jnp.concatenate(
                    [x_pad[b, 0:H, :], x_pad[b, 1:H + 1, :], x_pad[b, 2:H + 2, :]],
                    axis=-1)
                y = jnp.dot(a_mat, wmat, preferred_element_type=jnp.float32)
                y = y * scale + shift       # folded eval-mode BatchNorm affine
                if acts[l] == "relu":
                    y = jnp.maximum(y, 0.0)
                else:                       # sigmoid: exp (EUP) + approx recip (EUP)
                    y = pl.reciprocal(1.0 + jnp.exp(-y), approx=True)
                if l + 1 < n_layers:
                    # Hand the packed row-pairs to the next layer's padded scratch.
                    nxt = pad_refs[l + 1]
                    cn = Cout               # next layer's Cin
                    for i in range(H):
                        nxt[b, 2 * i + 1:2 * i + 2, cn:cn + half] = y[i:i + 1, 0:half]
                        nxt[b, 2 * i + 2:2 * i + 3, cn:cn + half] = y[i:i + 1, half:2 * half]
                else:
                    # Lane-dense final store: (H, 2*(2W)*Cout) = (8, 128) here.
                    o_ref[b, :, :] = y

    return kernel


def make_decoder_forward(input_shape, latent_size, n_conv, last_layer_channels,
                         feature_size, params, eps=1e-5):
    c_img, h_img, w_img = input_shape
    c0 = last_layer_channels * 2 ** (n_conv - 1)
    h0 = h_img // 2 ** n_conv
    w0 = w_img // 2 ** n_conv
    n_pix = c0 * h0 * w0

    # ---- trace-time parameter preprocessing (all weight-side) ----
    w1 = params["w1"]
    b1 = params["b1"][None, :]
    # Fold the NCHW->NHWC permutation implied by Unflatten2D into w2's columns.
    w2 = params["w2"].reshape(feature_size, c0, h0, w0).transpose(0, 2, 3, 1).reshape(feature_size, n_pix)
    b2 = params["b2"].reshape(c0, h0, w0).transpose(1, 2, 0).reshape(1, n_pix)

    layer_dims, conv_args, acts = [], [], []
    H, W = h0, w0
    for (w_t, gamma, beta, mean, var) in params["convs"]:
        cin_l, cout_l = w_t.shape[0], w_t.shape[1]
        inv_std = 1.0 / jnp.sqrt(var + eps)
        scale_c = gamma * inv_std
        shift_c = beta - mean * scale_c
        conv_args += [_row_pair_conv_matrix(w_t, W),
                      jnp.tile(scale_c, 2 * 2 * W)[None, :],
                      jnp.tile(shift_c, 2 * 2 * W)[None, :]]
        layer_dims.append((H, W, cin_l, cout_l))
        acts.append("relu")
        H, W = 2 * H, 2 * W
    w_last = params["w_last"]
    c_last_in, c_out = w_last.shape[0], w_last.shape[1]
    conv_args += [_row_pair_conv_matrix(w_last, W),
                  jnp.ones((1, 2 * 2 * W * c_out), jnp.float32),
                  jnp.zeros((1, 2 * 2 * W * c_out), jnp.float32)]
    layer_dims.append((H, W, c_last_in, c_out))
    acts.append("sigmoid")

    h_last, w_last_sp = layer_dims[-1][0], layer_dims[-1][1]
    n_last = 2 * (2 * w_last_sp) * c_out

    def forward(z):
        batch = z.shape[0]
        kernel = _build_kernel(batch, h0, w0, c0, layer_dims, acts)
        scratch = [pltpu.VMEM((batch, hh + 2, (ww + 2) * ci), jnp.float32)
                   for (hh, ww, ci, _) in layer_dims]
        out = pl.pallas_call(
            kernel,
            out_shape=jax.ShapeDtypeStruct((batch, h_last, n_last), jnp.float32),
            scratch_shapes=scratch,
        )(z, w1, b1, w2, b2, *conv_args)
        # (B, H/2, 2*W*C) is a contiguous view of NHWC (B, H, W, C); only the
        # final output-format permute to NCHW is left to XLA (one tiny op).
        out = out.reshape(batch, 2 * h_last, 2 * w_last_sp, c_out)
        return out.transpose(0, 3, 1, 2)

    return forward


# ---------------------------------------------------------------------------
# Demo / correctness check
# ---------------------------------------------------------------------------

if __name__ == "__main__":
    B = 2
    input_shape = (4, 16, 16)          # (C, H, W) of the decoded image
    latent_size = 8
    n_conv = 2
    last_layer_channels = 4
    feature_size = 32
    eps = 1e-5

    C_in, H_in, W_in = input_shape
    c0 = last_layer_channels * 2 ** (n_conv - 1)   # 8
    h0 = H_in // 2 ** n_conv                       # 4
    w0 = W_in // 2 ** n_conv                       # 4
    n_pix = c0 * h0 * w0                           # 128

    key = jax.random.PRNGKey(0)
    ks = jax.random.split(key, 16)
    z = jax.random.normal(ks[0], (B, latent_size), jnp.float32)

    w1 = 0.3 * jax.random.normal(ks[1], (latent_size, feature_size), jnp.float32)
    b1 = 0.1 * jax.random.normal(ks[2], (feature_size,), jnp.float32)
    w2 = 0.3 * jax.random.normal(ks[3], (feature_size, n_pix), jnp.float32)
    b2 = 0.1 * jax.random.normal(ks[4], (n_pix,), jnp.float32)

    conv_specs = []        # (w_t, gamma, beta, mean, var) per DecoderLayer2D
    kidx = 5
    for i in range(n_conv - 1, 0, -1):
        cin_ = last_layer_channels * 2 ** i
        cout_ = last_layer_channels * 2 ** (i - 1)
        w_t = 0.25 * jax.random.normal(ks[kidx], (cin_, cout_, 4, 4), jnp.float32); kidx += 1
        gamma = 1.0 + 0.1 * jax.random.normal(ks[kidx], (cout_,), jnp.float32); kidx += 1
        beta = 0.1 * jax.random.normal(ks[kidx], (cout_,), jnp.float32); kidx += 1
        mean = 0.1 * jax.random.normal(ks[kidx], (cout_,), jnp.float32); kidx += 1
        var = jnp.abs(jax.random.normal(ks[kidx], (cout_,), jnp.float32)) + 0.5; kidx += 1
        conv_specs.append((w_t, gamma, beta, mean, var))
    w_last = 0.25 * jax.random.normal(ks[kidx], (last_layer_channels, C_in, 4, 4), jnp.float32)

    params = dict(w1=w1, b1=b1, w2=w2, b2=b2, convs=conv_specs, w_last=w_last)
    forward = make_decoder_forward(input_shape, latent_size, n_conv,
                                   last_layer_channels, feature_size, params, eps=eps)

    out = jax.jit(forward)(z)
    out = jax.block_until_ready(out)

    # -------------------- pure-JAX reference (PyTorch semantics) -------------
    hp = jax.lax.Precision.HIGHEST

    def convt_ref(x_nchw, w_t):
        k = w_t.shape[2]
        w_conv = jnp.flip(w_t, axis=(2, 3)).transpose(1, 0, 2, 3)   # (Cout,Cin,K,K)
        return jax.lax.conv_general_dilated(
            x_nchw, w_conv, window_strides=(1, 1),
            padding=[(k - 2, k - 2), (k - 2, k - 2)],               # k-1-p, p=1
            lhs_dilation=(2, 2),
            dimension_numbers=("NCHW", "OIHW", "NCHW"),
            precision=hp)

    def reference(z_in):
        h = jax.nn.relu(jnp.dot(z_in, w1, precision=hp) + b1)
        p = jax.nn.relu(jnp.dot(h, w2, precision=hp) + b2)
        x = p.reshape(B, c0, h0, w0)          # Unflatten2D (.view)
        x = jax.nn.relu(x)
        for (w_t, gamma, beta, mean, var) in conv_specs:
            x = convt_ref(x, w_t)
            x = (x - mean.reshape(1, -1, 1, 1)) / jnp.sqrt(var.reshape(1, -1, 1, 1) + eps)
            x = gamma.reshape(1, -1, 1, 1) * x + beta.reshape(1, -1, 1, 1)
            x = jax.nn.relu(x)
        x = convt_ref(x, w_last)
        return jax.nn.sigmoid(x)

    ref = jax.block_until_ready(reference(z))

    assert out.shape == (B, C_in, H_in, W_in), out.shape
    assert out.dtype == jnp.float32
    # Tolerance floor is the EUP approximate-reciprocal sigmoid (~1e-3);
    # the rest of the path is f32 MXU/VPU (agrees to ~1e-5).
    assert bool(jnp.allclose(out, ref, atol=5e-3, rtol=5e-3)), \
        float(jnp.max(jnp.abs(out - ref)))

    print("KERNEL_OK")
</pallas_src>

<mosaic_0001>
module attributes {stable_mosaic.version = 11 : i64} {
  func.func @kernel(%arg0: memref<2x8xf32, #tpu.memory_space<vmem>>, %arg1: memref<8x32xf32, #tpu.memory_space<vmem>>, %arg2: memref<1x32xf32, #tpu.memory_space<vmem>>, %arg3: memref<32x128xf32, #tpu.memory_space<vmem>>, %arg4: memref<1x128xf32, #tpu.memory_space<vmem>>, %arg5: memref<144x64xf32, #tpu.memory_space<vmem>>, %arg6: memref<1x64xf32, #tpu.memory_space<vmem>>, %arg7: memref<1x64xf32, #tpu.memory_space<vmem>>, %arg8: memref<120x128xf32, #tpu.memory_space<vmem>>, %arg9: memref<1x128xf32, #tpu.memory_space<vmem>>, %arg10: memref<1x128xf32, #tpu.memory_space<vmem>>, %arg11: memref<2x8x128xf32, #tpu.memory_space<vmem>>, %arg12: memref<2x6x48xf32, #tpu.memory_space<vmem>>, %arg13: memref<2x10x40xf32, #tpu.memory_space<vmem>>) attributes {dimension_semantics = [], scalar_prefetch = 0 : i64, scratch_operands = 2 : i64, tpu.core_type = #tpu.core_type<tc>} {
    %cst = arith.constant 0.000000e+00 : f32
    %0 = vector.broadcast %cst : f32 to vector<2x6x48xf32>
    %c0 = arith.constant 0 : index
    %c0_0 = arith.constant 0 : index
    %c0_1 = arith.constant 0 : index
    %1 = vector.load %arg12[%c0, %c0_0, %c0_1] : memref<2x6x48xf32, #tpu.memory_space<vmem>>, vector<2x6x48xf32>
    tpu.vector_store %arg12[%c0, %c0_0, %c0_1], %0 {strides = array<i32>} : memref<2x6x48xf32, #tpu.memory_space<vmem>>, vector<2x6x48xf32>,
    %cst_2 = arith.constant 0.000000e+00 : f32
    %2 = vector.broadcast %cst_2 : f32 to vector<2x10x40xf32>
    %c0_3 = arith.constant 0 : index
    %c0_4 = arith.constant 0 : index
    %c0_5 = arith.constant 0 : index
    %3 = vector.load %arg13[%c0_3, %c0_4, %c0_5] : memref<2x10x40xf32, #tpu.memory_space<vmem>>, vector<2x10x40xf32>
    tpu.vector_store %arg13[%c0_3, %c0_4, %c0_5], %2 {strides = array<i32>} : memref<2x10x40xf32, #tpu.memory_space<vmem>>, vector<2x10x40xf32>,
    %c0_6 = arith.constant 0 : index
    %c0_7 = arith.constant 0 : index
    %4 = vector.load %arg0[%c0_6, %c0_7] : memref<2x8xf32, #tpu.memory_space<vmem>>, vector<2x8xf32>
    %c0_8 = arith.constant 0 : index
    %c0_9 = arith.constant 0 : index
    %5 = vector.load %arg1[%c0_8, %c0_9] : memref<8x32xf32, #tpu.memory_space<vmem>>, vector<8x32xf32>
    %cst_10 = arith.constant dense<0.000000e+00> : vector<2x32xf32>
    %6 = tpu.matmul %4, %5, %cst_10 {dimension_numbers = #tpu.dot_dimension_numbers<[1], [0], [0], [1], [0, 0, 1, 1], [], []>} : vector<2x8xf32>, vector<8x32xf32>, vector<2x32xf32> -> vector<2x32xf32>
    %c0_11 = arith.constant 0 : index
    %c0_12 = arith.constant 0 : index
    %7 = vector.load %arg2[%c0_11, %c0_12] : memref<1x32xf32, #tpu.memory_space<vmem>>, vector<1x32xf32>
    %8 = vector.broadcast %7 : vector<1x32xf32> to vector<2x32xf32>
    %9 = arith.addf %6, %8 : vector<2x32xf32>
    %cst_13 = arith.constant 0.000000e+00 : f32
    %10 = vector.broadcast %cst_13 : f32 to vector<2x32xf32>
    %11 = arith.maximumf %9, %10 : vector<2x32xf32>
    %c0_14 = arith.constant 0 : index
    %c0_15 = arith.constant 0 : index
    %12 = vector.load %arg3[%c0_14, %c0_15] : memref<32x128xf32, #tpu.memory_space<vmem>>, vector<32x128xf32>
    %cst_16 = arith.constant dense<0.000000e+00> : vector<2x128xf32>
    %13 = tpu.matmul %11, %12, %cst_16 {dimension_numbers = #tpu.dot_dimension_numbers<[1], [0], [0], [1], [0, 0, 1, 1], [], []>} : vector<2x32xf32>, vector<32x128xf32>, vector<2x128xf32> -> vector<2x128xf32>
    %c0_17 = arith.constant 0 : index
    %c0_18 = arith.constant 0 : index
    %14 = vector.load %arg4[%c0_17, %c0_18] : memref<1x128xf32, #tpu.memory_space<vmem>>, vector<1x128xf32>
    %15 = vector.broadcast %14 : vector<1x128xf32> to vector<2x128xf32>
    %16 = arith.addf %13, %15 : vector<2x128xf32>
    %cst_19 = arith.constant 0.000000e+00 : f32
    %17 = vector.broadcast %cst_19 : f32 to vector<2x128xf32>
    %18 = arith.maximumf %16, %17 : vector<2x128xf32>
    %19 = vector.extract_strided_slice %18 {offsets = [0, 0], sizes = [1, 32], strides = [1, 1]} : vector<2x128xf32> to vector<1x32xf32>
    %c0_20 = arith.constant 0 : index
    %c1 = arith.constant 1 : index
    %c8 = arith.constant 8 : index
    %20 = vector.load %arg12[%c0_20, %c1, %c8] : memref<2x6x48xf32, #tpu.memory_space<vmem>>, vector<1x1x32xf32>
    %21 = vector.shape_cast %20 : vector<1x1x32xf32> to vector<1x32xf32>
    %22 = vector.shape_cast %19 : vector<1x32xf32> to vector<1x1x32xf32>
    tpu.vector_store %arg12[%c0_20, %c1, %c8], %22 {strides = array<i32>} : memref<2x6x48xf32, #tpu.memory_space<vmem>>, vector<1x1x32xf32>,
    %23 = vector.extract_strided_slice %18 {offsets = [0, 32], sizes = [1, 32], strides = [1, 1]} : vector<2x128xf32> to vector<1x32xf32>
    %c0_21 = arith.constant 0 : index
    %c2 = arith.constant 2 : index
    %c8_22 = arith.constant 8 : index
    %24 = vector.load %arg12[%c0_21, %c2, %c8_22] : memref<2x6x48xf32, #tpu.memory_space<vmem>>, vector<1x1x32xf32>
    %25 = vector.shape_cast %24 : vector<1x1x32xf32> to vector<1x32xf32>
    %26 = vector.shape_cast %23 : vector<1x32xf32> to vector<1x1x32xf32>
    tpu.vector_store %arg12[%c0_21, %c2, %c8_22], %26 {strides = array<i32>} : memref<2x6x48xf32, #tpu.memory_space<vmem>>, vector<1x1x32xf32>,
    %27 = vector.extract_strided_slice %18 {offsets = [0, 64], sizes = [1, 32], strides = [1, 1]} : vector<2x128xf32> to vector<1x32xf32>
    %c0_23 = arith.constant 0 : index
    %c3 = arith.constant 3 : index
    %c8_24 = arith.constant 8 : index
    %28 = vector.load %arg12[%c0_23, %c3, %c8_24] : memref<2x6x48xf32, #tpu.memory_space<vmem>>, vector<1x1x32xf32>
    %29 = vector.shape_cast %28 : vector<1x1x32xf32> to vector<1x32xf32>
    %30 = vector.shape_cast %27 : vector<1x32xf32> to vector<1x1x32xf32>
    tpu.vector_store %arg12[%c0_23, %c3, %c8_24], %30 {strides = array<i32>} : memref<2x6x48xf32, #tpu.memory_space<vmem>>, vector<1x1x32xf32>,
    %31 = vector.extract_strided_slice %18 {offsets = [0, 96], sizes = [1, 32], strides = [1, 1]} : vector<2x128xf32> to vector<1x32xf32>
    %c0_25 = arith.constant 0 : index
    %c4 = arith.constant 4 : index
    %c8_26 = arith.constant 8 : index
    %32 = vector.load %arg12[%c0_25, %c4, %c8_26] : memref<2x6x48xf32, #tpu.memory_space<vmem>>, vector<1x1x32xf32>
    %33 = vector.shape_cast %32 : vector<1x1x32xf32> to vector<1x32xf32>
    %34 = vector.shape_cast %31 : vector<1x32xf32> to vector<1x1x32xf32>
    tpu.vector_store %arg12[%c0_25, %c4, %c8_26], %34 {strides = array<i32>} : memref<2x6x48xf32, #tpu.memory_space<vmem>>, vector<1x1x32xf32>,
    %35 = vector.extract_strided_slice %18 {offsets = [1, 0], sizes = [1, 32], strides = [1, 1]} : vector<2x128xf32> to vector<1x32xf32>
    %c1_27 = arith.constant 1 : index
    %c1_28 = arith.constant 1 : index
    %c8_29 = arith.constant 8 : index
    %36 = vector.load %arg12[%c1_27, %c1_28, %c8_29] : memref<2x6x48xf32, #tpu.memory_space<vmem>>, vector<1x1x32xf32>
    %37 = vector.shape_cast %36 : vector<1x1x32xf32> to vector<1x32xf32>
    %38 = vector.shape_cast %35 : vector<1x32xf32> to vector<1x1x32xf32>
    tpu.vector_store %arg12[%c1_27, %c1_28, %c8_29], %38 {strides = array<i32>} : memref<2x6x48xf32, #tpu.memory_space<vmem>>, vector<1x1x32xf32>,
    %39 = vector.extract_strided_slice %18 {offsets = [1, 32], sizes = [1, 32], strides = [1, 1]} : vector<2x128xf32> to vector<1x32xf32>
    %c1_30 = arith.constant 1 : index
    %c2_31 = arith.constant 2 : index
    %c8_32 = arith.constant 8 : index
    %40 = vector.load %arg12[%c1_30, %c2_31, %c8_32] : memref<2x6x48xf32, #tpu.memory_space<vmem>>, vector<1x1x32xf32>
    %41 = vector.shape_cast %40 : vector<1x1x32xf32> to vector<1x32xf32>
    %42 = vector.shape_cast %39 : vector<1x32xf32> to vector<1x1x32xf32>
    tpu.vector_store %arg12[%c1_30, %c2_31, %c8_32], %42 {strides = array<i32>} : memref<2x6x48xf32, #tpu.memory_space<vmem>>, vector<1x1x32xf32>,
    %43 = vector.extract_strided_slice %18 {offsets = [1, 64], sizes = [1, 32], strides = [1, 1]} : vector<2x128xf32> to vector<1x32xf32>
    %c1_33 = arith.constant 1 : index
    %c3_34 = arith.constant 3 : index
    %c8_35 = arith.constant 8 : index
    %44 = vector.load %arg12[%c1_33, %c3_34, %c8_35] : memref<2x6x48xf32, #tpu.memory_space<vmem>>, vector<1x1x32xf32>
    %45 = vector.shape_cast %44 : vector<1x1x32xf32> to vector<1x32xf32>
    %46 = vector.shape_cast %43 : vector<1x32xf32> to vector<1x1x32xf32>
    tpu.vector_store %arg12[%c1_33, %c3_34, %c8_35], %46 {strides = array<i32>} : memref<2x6x48xf32, #tpu.memory_space<vmem>>, vector<1x1x32xf32>,
    %47 = vector.extract_strided_slice %18 {offsets = [1, 96], sizes = [1, 32], strides = [1, 1]} : vector<2x128xf32> to vector<1x32xf32>
    %c1_36 = arith.constant 1 : index
    %c4_37 = arith.constant 4 : index
    %c8_38 = arith.constant 8 : index
    %48 = vector.load %arg12[%c1_36, %c4_37, %c8_38] : memref<2x6x48xf32, #tpu.memory_space<vmem>>, vector<1x1x32xf32>
    %49 = vector.shape_cast %48 : vector<1x1x32xf32> to vector<1x32xf32>
    %50 = vector.shape_cast %47 : vector<1x32xf32> to vector<1x1x32xf32>
    tpu.vector_store %arg12[%c1_36, %c4_37, %c8_38], %50 {strides = array<i32>} : memref<2x6x48xf32, #tpu.memory_space<vmem>>, vector<1x1x32xf32>,
    %c0_39 = arith.constant 0 : index
    %c0_40 = arith.constant 0 : index
    %51 = vector.load %arg5[%c0_39, %c0_40] : memref<144x64xf32, #tpu.memory_space<vmem>>, vector<144x64xf32>
    %c0_41 = arith.constant 0 : index
    %c0_42 = arith.constant 0 : index
    %52 = vector.load %arg6[%c0_41, %c0_42] : memref<1x64xf32, #tpu.memory_space<vmem>>, vector<1x64xf32>
    %c0_43 = arith.constant 0 : index
    %c0_44 = arith.constant 0 : index
    %53 = vector.load %arg7[%c0_43, %c0_44] : memref<1x64xf32, #tpu.memory_space<vmem>>, vector<1x64xf32>
    %c0_45 = arith.constant 0 : index
    %c0_46 = arith.constant 0 : index
    %c0_47 = arith.constant 0 : index
    %54 = vector.load %arg12[%c0_45, %c0_46, %c0_47] : memref<2x6x48xf32, #tpu.memory_space<vmem>>, vector<1x4x48xf32>
    %55 = vector.shape_cast %54 : vector<1x4x48xf32> to vector<4x48xf32>
    %c0_48 = arith.constant 0 : index
    %c1_49 = arith.constant 1 : index
    %c0_50 = arith.constant 0 : index
    %56 = vector.load %arg12[%c0_48, %c1_49, %c0_50] : memref<2x6x48xf32, #tpu.memory_space<vmem>>, vector<1x4x48xf32>
    %57 = vector.shape_cast %56 : vector<1x4x48xf32> to vector<4x48xf32>
    %c0_51 = arith.constant 0 : index
    %c2_52 = arith.constant 2 : index
    %c0_53 = arith.constant 0 : index
    %58 = vector.load %arg12[%c0_51, %c2_52, %c0_53] : memref<2x6x48xf32, #tpu.memory_space<vmem>>, vector<1x4x48xf32>
    %59 = vector.shape_cast %58 : vector<1x4x48xf32> to vector<4x48xf32>
    %60 = tpu.concatenate %55, %57, %59 in 1 : vector<4x48xf32>, vector<4x48xf32>, vector<4x48xf32> -> vector<4x144xf32>
    %cst_54 = arith.constant dense<0.000000e+00> : vector<4x64xf32>
    %61 = tpu.matmul %60, %51, %cst_54 {dimension_numbers = #tpu.dot_dimension_numbers<[1], [0], [0], [1], [0, 0, 1, 1], [], []>} : vector<4x144xf32>, vector<144x64xf32>, vector<4x64xf32> -> vector<4x64xf32>
    %62 = vector.broadcast %52 : vector<1x64xf32> to vector<4x64xf32>
    %63 = arith.mulf %61, %62 : vector<4x64xf32>
    %64 = vector.broadcast %53 : vector<1x64xf32> to vector<4x64xf32>
    %65 = arith.addf %63, %64 : vector<4x64xf32>
    %cst_55 = arith.constant 0.000000e+00 : f32
    %66 = vector.broadcast %cst_55 : f32 to vector<4x64xf32>
    %67 = arith.maximumf %65, %66 : vector<4x64xf32>
    %68 = vector.extract_strided_slice %67 {offsets = [0, 0], sizes = [1, 32], strides = [1, 1]} : vector<4x64xf32> to vector<1x32xf32>
    %c0_56 = arith.constant 0 : index
    %c1_57 = arith.constant 1 : index
    %c4_58 = arith.constant 4 : index
    %69 = vector.load %arg13[%c0_56, %c1_57, %c4_58] : memref<2x10x40xf32, #tpu.memory_space<vmem>>, vector<1x1x32xf32>
    %70 = vector.shape_cast %69 : vector<1x1x32xf32> to vector<1x32xf32>
    %71 = vector.shape_cast %68 : vector<1x32xf32> to vector<1x1x32xf32>
    tpu.vector_store %arg13[%c0_56, %c1_57, %c4_58], %71 {strides = array<i32>} : memref<2x10x40xf32, #tpu.memory_space<vmem>>, vector<1x1x32xf32>,
    %72 = vector.extract_strided_slice %67 {offsets = [0, 32], sizes = [1, 32], strides = [1, 1]} : vector<4x64xf32> to vector<1x32xf32>
    %c0_59 = arith.constant 0 : index
    %c2_60 = arith.constant 2 : index
    %c4_61 = arith.constant 4 : index
    %73 = vector.load %arg13[%c0_59, %c2_60, %c4_61] : memref<2x10x40xf32, #tpu.memory_space<vmem>>, vector<1x1x32xf32>
    %74 = vector.shape_cast %73 : vector<1x1x32xf32> to vector<1x32xf32>
    %75 = vector.shape_cast %72 : vector<1x32xf32> to vector<1x1x32xf32>
    tpu.vector_store %arg13[%c0_59, %c2_60, %c4_61], %75 {strides = array<i32>} : memref<2x10x40xf32, #tpu.memory_space<vmem>>, vector<1x1x32xf32>,
    %76 = vector.extract_strided_slice %67 {offsets = [1, 0], sizes = [1, 32], strides = [1, 1]} : vector<4x64xf32> to vector<1x32xf32>
    %c0_62 = arith.constant 0 : index
    %c3_63 = arith.constant 3 : index
    %c4_64 = arith.constant 4 : index
    %77 = vector.load %arg13[%c0_62, %c3_63, %c4_64] : memref<2x10x40xf32, #tpu.memory_space<vmem>>, vector<1x1x32xf32>
    %78 = vector.shape_cast %77 : vector<1x1x32xf32> to vector<1x32xf32>
    %79 = vector.shape_cast %76 : vector<1x32xf32> to vector<1x1x32xf32>
    tpu.vector_store %arg13[%c0_62, %c3_63, %c4_64], %79 {strides = array<i32>} : memref<2x10x40xf32, #tpu.memory_space<vmem>>, vector<1x1x32xf32>,
    %80 = vector.extract_strided_slice %67 {offsets = [1, 32], sizes = [1, 32], strides = [1, 1]} : vector<4x64xf32> to vector<1x32xf32>
    %c0_65 = arith.constant 0 : index
    %c4_66 = arith.constant 4 : index
    %c4_67 = arith.constant 4 : index
    %81 = vector.load %arg13[%c0_65, %c4_66, %c4_67] : memref<2x10x40xf32, #tpu.memory_space<vmem>>, vector<1x1x32xf32>
    %82 = vector.shape_cast %81 : vector<1x1x32xf32> to vector<1x32xf32>
    %83 = vector.shape_cast %80 : vector<1x32xf32> to vector<1x1x32xf32>
    tpu.vector_store %arg13[%c0_65, %c4_66, %c4_67], %83 {strides = array<i32>} : memref<2x10x40xf32, #tpu.memory_space<vmem>>, vector<1x1x32xf32>,
    %84 = vector.extract_strided_slice %67 {offsets = [2, 0], sizes = [1, 32], strides = [1, 1]} : vector<4x64xf32> to vector<1x32xf32>
    %c0_68 = arith.constant 0 : index
    %c5 = arith.constant 5 : index
    %c4_69 = arith.constant 4 : index
    %85 = vector.load %arg13[%c0_68, %c5, %c4_69] : memref<2x10x40xf32, #tpu.memory_space<vmem>>, vector<1x1x32xf32>
    %86 = vector.shape_cast %85 : vector<1x1x32xf32> to vector<1x32xf32>
    %87 = vector.shape_cast %84 : vector<1x32xf32> to vector<1x1x32xf32>
    tpu.vector_store %arg13[%c0_68, %c5, %c4_69], %87 {strides = array<i32>} : memref<2x10x40xf32, #tpu.memory_space<vmem>>, vector<1x1x32xf32>,
    %88 = vector.extract_strided_slice %67 {offsets = [2, 32], sizes = [1, 32], strides = [1, 1]} : vector<4x64xf32> to vector<1x32xf32>
    %c0_70 = arith.constant 0 : index
    %c6 = arith.constant 6 : index
    %c4_71 = arith.constant 4 : index
    %89 = vector.load %arg13[%c0_70, %c6, %c4_71] : memref<2x10x40xf32, #tpu.memory_space<vmem>>, vector<1x1x32xf32>
    %90 = vector.shape_cast %89 : vector<1x1x32xf32> to vector<1x32xf32>
    %91 = vector.shape_cast %88 : vector<1x32xf32> to vector<1x1x32xf32>
    tpu.vector_store %arg13[%c0_70, %c6, %c4_71], %91 {strides = array<i32>} : memref<2x10x40xf32, #tpu.memory_space<vmem>>, vector<1x1x32xf32>,
    %92 = vector.extract_strided_slice %67 {offsets = [3, 0], sizes = [1, 32], strides = [1, 1]} : vector<4x64xf32> to vector<1x32xf32>
    %c0_72 = arith.constant 0 : index
    %c7 = arith.constant 7 : index
    %c4_73 = arith.constant 4 : index
    %93 = vector.load %arg13[%c0_72, %c7, %c4_73] : memref<2x10x40xf32, #tpu.memory_space<vmem>>, vector<1x1x32xf32>
    %94 = vector.shape_cast %93 : vector<1x1x32xf32> to vector<1x32xf32>
    %95 = vector.shape_cast %92 : vector<1x32xf32> to vector<1x1x32xf32>
    tpu.vector_store %arg13[%c0_72, %c7, %c4_73], %95 {strides = array<i32>} : memref<2x10x40xf32, #tpu.memory_space<vmem>>, vector<1x1x32xf32>,
    %96 = vector.extract_strided_slice %67 {offsets = [3, 32], sizes = [1, 32], strides = [1, 1]} : vector<4x64xf32> to vector<1x32xf32>
    %c0_74 = arith.constant 0 : index
    %c8_75 = arith.constant 8 : index
    %c4_76 = arith.constant 4 : index
    %97 = vector.load %arg13[%c0_74, %c8_75, %c4_76] : memref<2x10x40xf32, #tpu.memory_space<vmem>>, vector<1x1x32xf32>
    %98 = vector.shape_cast %97 : vector<1x1x32xf32> to vector<1x32xf32>
    %99 = vector.shape_cast %96 : vector<1x32xf32> to vector<1x1x32xf32>
    tpu.vector_store %arg13[%c0_74, %c8_75, %c4_76], %99 {strides = array<i32>} : memref<2x10x40xf32, #tpu.memory_space<vmem>>, vector<1x1x32xf32>,
    %c1_77 = arith.constant 1 : index
    %c0_78 = arith.constant 0 : index
    %c0_79 = arith.constant 0 : index
    %100 = vector.load %arg12[%c1_77, %c0_78, %c0_79] : memref<2x6x48xf32, #tpu.memory_space<vmem>>, vector<1x4x48xf32>
    %101 = vector.shape_cast %100 : vector<1x4x48xf32> to vector<4x48xf32>
    %c1_80 = arith.constant 1 : index
    %c1_81 = arith.constant 1 : index
    %c0_82 = arith.constant 0 : index
    %102 = vector.load %arg12[%c1_80, %c1_81, %c0_82] : memref<2x6x48xf32, #tpu.memory_space<vmem>>, vector<1x4x48xf32>
    %103 = vector.shape_cast %102 : vector<1x4x48xf32> to vector<4x48xf32>
    %c1_83 = arith.constant 1 : index
    %c2_84 = arith.constant 2 : index
    %c0_85 = arith.constant 0 : index
    %104 = vector.load %arg12[%c1_83, %c2_84, %c0_85] : memref<2x6x48xf32, #tpu.memory_space<vmem>>, vector<1x4x48xf32>
    %105 = vector.shape_cast %104 : vector<1x4x48xf32> to vector<4x48xf32>
    %106 = tpu.concatenate %101, %103, %105 in 1 : vector<4x48xf32>, vector<4x48xf32>, vector<4x48xf32> -> vector<4x144xf32>
    %cst_86 = arith.constant dense<0.000000e+00> : vector<4x64xf32>
    %107 = tpu.matmul %106, %51, %cst_86 {dimension_numbers = #tpu.dot_dimension_numbers<[1], [0], [0], [1], [0, 0, 1, 1], [], []>} : vector<4x144xf32>, vector<144x64xf32>, vector<4x64xf32> -> vector<4x64xf32>
    %108 = vector.broadcast %52 : vector<1x64xf32> to vector<4x64xf32>
    %109 = arith.mulf %107, %108 : vector<4x64xf32>
    %110 = vector.broadcast %53 : vector<1x64xf32> to vector<4x64xf32>
    %111 = arith.addf %109, %110 : vector<4x64xf32>
    %cst_87 = arith.constant 0.000000e+00 : f32
    %112 = vector.broadcast %cst_87 : f32 to vector<4x64xf32>
    %113 = arith.maximumf %111, %112 : vector<4x64xf32>
    %114 = vector.extract_strided_slice %113 {offsets = [0, 0], sizes = [1, 32], strides = [1, 1]} : vector<4x64xf32> to vector<1x32xf32>
    %c1_88 = arith.constant 1 : index
    %c1_89 = arith.constant 1 : index
    %c4_90 = arith.constant 4 : index
    %115 = vector.load %arg13[%c1_88, %c1_89, %c4_90] : memref<2x10x40xf32, #tpu.memory_space<vmem>>, vector<1x1x32xf32>
    %116 = vector.shape_cast %115 : vector<1x1x32xf32> to vector<1x32xf32>
    %117 = vector.shape_cast %114 : vector<1x32xf32> to vector<1x1x32xf32>
    tpu.vector_store %arg13[%c1_88, %c1_89, %c4_90], %117 {strides = array<i32>} : memref<2x10x40xf32, #tpu.memory_space<vmem>>, vector<1x1x32xf32>,
    %118 = vector.extract_strided_slice %113 {offsets = [0, 32], sizes = [1, 32], strides = [1, 1]} : vector<4x64xf32> to vector<1x32xf32>
    %c1_91 = arith.constant 1 : index
    %c2_92 = arith.constant 2 : index
    %c4_93 = arith.constant 4 : index
    %119 = vector.load %arg13[%c1_91, %c2_92, %c4_93] : memref<2x10x40xf32, #tpu.memory_space<vmem>>, vector<1x1x32xf32>
    %120 = vector.shape_cast %119 : vector<1x1x32xf32> to vector<1x32xf32>
    %121 = vector.shape_cast %118 : vector<1x32xf32> to vector<1x1x32xf32>
    tpu.vector_store %arg13[%c1_91, %c2_92, %c4_93], %121 {strides = array<i32>} : memref<2x10x40xf32, #tpu.memory_space<vmem>>, vector<1x1x32xf32>,
    %122 = vector.extract_strided_slice %113 {offsets = [1, 0], sizes = [1, 32], strides = [1, 1]} : vector<4x64xf32> to vector<1x32xf32>
    %c1_94 = arith.constant 1 : index
    %c3_95 = arith.constant 3 : index
    %c4_96 = arith.constant 4 : index
    %123 = vector.load %arg13[%c1_94, %c3_95, %c4_96] : memref<2x10x40xf32, #tpu.memory_space<vmem>>, vector<1x1x32xf32>
    %124 = vector.shape_cast %123 : vector<1x1x32xf32> to vector<1x32xf32>
    %125 = vector.shape_cast %122 : vector<1x32xf32> to vector<1x1x32xf32>
    tpu.vector_store %arg13[%c1_94, %c3_95, %c4_96], %125 {strides = array<i32>} : memref<2x10x40xf32, #tpu.memory_space<vmem>>, vector<1x1x32xf32>,
    %126 = vector.extract_strided_slice %113 {offsets = [1, 32], sizes = [1, 32], strides = [1, 1]} : vector<4x64xf32> to vector<1x32xf32>
    %c1_97 = arith.constant 1 : index
    %c4_98 = arith.constant 4 : index
    %c4_99 = arith.constant 4 : index
    %127 = vector.load %arg13[%c1_97, %c4_98, %c4_99] : memref<2x10x40xf32, #tpu.memory_space<vmem>>, vector<1x1x32xf32>
    %128 = vector.shape_cast %127 : vector<1x1x32xf32> to vector<1x32xf32>
    %129 = vector.shape_cast %126 : vector<1x32xf32> to vector<1x1x32xf32>
    tpu.vector_store %arg13[%c1_97, %c4_98, %c4_99], %129 {strides = array<i32>} : memref<2x10x40xf32, #tpu.memory_space<vmem>>, vector<1x1x32xf32>,
    %130 = vector.extract_strided_slice %113 {offsets = [2, 0], sizes = [1, 32], strides = [1, 1]} : vector<4x64xf32> to vector<1x32xf32>
    %c1_100 = arith.constant 1 : index
    %c5_101 = arith.constant 5 : index
    %c4_102 = arith.constant 4 : index
    %131 = vector.load %arg13[%c1_100, %c5_101, %c4_102] : memref<2x10x40xf32, #tpu.memory_space<vmem>>, vector<1x1x32xf32>
    %132 = vector.shape_cast %131 : vector<1x1x32xf32> to vector<1x32xf32>
    %133 = vector.shape_cast %130 : vector<1x32xf32> to vector<1x1x32xf32>
    tpu.vector_store %arg13[%c1_100, %c5_101, %c4_102], %133 {strides = array<i32>} : memref<2x10x40xf32, #tpu.memory_space<vmem>>, vector<1x1x32xf32>,
    %134 = vector.extract_strided_slice %113 {offsets = [2, 32], sizes = [1, 32], strides = [1, 1]} : vector<4x64xf32> to vector<1x32xf32>
    %c1_103 = arith.constant 1 : index
    %c6_104 = arith.constant 6 : index
    %c4_105 = arith.constant 4 : index
    %135 = vector.load %arg13[%c1_103, %c6_104, %c4_105] : memref<2x10x40xf32, #tpu.memory_space<vmem>>, vector<1x1x32xf32>
    %136 = vector.shape_cast %135 : vector<1x1x32xf32> to vector<1x32xf32>
    %137 = vector.shape_cast %134 : vector<1x32xf32> to vector<1x1x32xf32>
    tpu.vector_store %arg13[%c1_103, %c6_104, %c4_105], %137 {strides = array<i32>} : memref<2x10x40xf32, #tpu.memory_space<vmem>>, vector<1x1x32xf32>,
    %138 = vector.extract_strided_slice %113 {offsets = [3, 0], sizes = [1, 32], strides = [1, 1]} : vector<4x64xf32> to vector<1x32xf32>
    %c1_106 = arith.constant 1 : index
    %c7_107 = arith.constant 7 : index
    %c4_108 = arith.constant 4 : index
    %139 = vector.load %arg13[%c1_106, %c7_107, %c4_108] : memref<2x10x40xf32, #tpu.memory_space<vmem>>, vector<1x1x32xf32>
    %140 = vector.shape_cast %139 : vector<1x1x32xf32> to vector<1x32xf32>
    %141 = vector.shape_cast %138 : vector<1x32xf32> to vector<1x1x32xf32>
    tpu.vector_store %arg13[%c1_106, %c7_107, %c4_108], %141 {strides = array<i32>} : memref<2x10x40xf32, #tpu.memory_space<vmem>>, vector<1x1x32xf32>,
    %142 = vector.extract_strided_slice %113 {offsets = [3, 32], sizes = [1, 32], strides = [1, 1]} : vector<4x64xf32> to vector<1x32xf32>
    %c1_109 = arith.constant 1 : index
    %c8_110 = arith.constant 8 : index
    %c4_111 = arith.constant 4 : index
    %143 = vector.load %arg13[%c1_109, %c8_110, %c4_111] : memref<2x10x40xf32, #tpu.memory_space<vmem>>, vector<1x1x32xf32>
    %144 = vector.shape_cast %143 : vector<1x1x32xf32> to vector<1x32xf32>
    %145 = vector.shape_cast %142 : vector<1x32xf32> to vector<1x1x32xf32>
    tpu.vector_store %arg13[%c1_109, %c8_110, %c4_111], %145 {strides = array<i32>} : memref<2x10x40xf32, #tpu.memory_space<vmem>>, vector<1x1x32xf32>,
    %c0_112 = arith.constant 0 : index
    %c0_113 = arith.constant 0 : index
    %146 = vector.load %arg8[%c0_112, %c0_113] : memref<120x128xf32, #tpu.memory_space<vmem>>, vector<120x128xf32>
    %c0_114 = arith.constant 0 : index
    %c0_115 = arith.constant 0 : index
    %147 = vector.load %arg9[%c0_114, %c0_115] : memref<1x128xf32, #tpu.memory_space<vmem>>, vector<1x128xf32>
    %c0_116 = arith.constant 0 : index
    %c0_117 = arith.constant 0 : index
    %148 = vector.load %arg10[%c0_116, %c0_117] : memref<1x128xf32, #tpu.memory_space<vmem>>, vector<1x128xf32>
    %c0_118 = arith.constant 0 : index
    %c0_119 = arith.constant 0 : index
    %c0_120 = arith.constant 0 : index
    %149 = vector.load %arg13[%c0_118, %c0_119, %c0_120] : memref<2x10x40xf32, #tpu.memory_space<vmem>>, vector<1x8x40xf32>
    %150 = vector.shape_cast %149 : vector<1x8x40xf32> to vector<8x40xf32>
    %c0_121 = arith.constant 0 : index
    %c1_122 = arith.constant 1 : index
    %c0_123 = arith.constant 0 : index
    %151 = vector.load %arg13[%c0_121, %c1_122, %c0_123] : memref<2x10x40xf32, #tpu.memory_space<vmem>>, vector<1x8x40xf32>
    %152 = vector.shape_cast %151 : vector<1x8x40xf32> to vector<8x40xf32>
    %c0_124 = arith.constant 0 : index
    %c2_125 = arith.constant 2 : index
    %c0_126 = arith.constant 0 : index
    %153 = vector.load %arg13[%c0_124, %c2_125, %c0_126] : memref<2x10x40xf32, #tpu.memory_space<vmem>>, vector<1x8x40xf32>
    %154 = vector.shape_cast %153 : vector<1x8x40xf32> to vector<8x40xf32>
    %155 = tpu.concatenate %150, %152, %154 in 1 : vector<8x40xf32>, vector<8x40xf32>, vector<8x40xf32> -> vector<8x120xf32>
    %cst_127 = arith.constant dense<0.000000e+00> : vector<8x128xf32>
    %156 = tpu.matmul %155, %146, %cst_127 {dimension_numbers = #tpu.dot_dimension_numbers<[1], [0], [0], [1], [0, 0, 1, 1], [], []>} : vector<8x120xf32>, vector<120x128xf32>, vector<8x128xf32> -> vector<8x128xf32>
    %157 = vector.broadcast %147 : vector<1x128xf32> to vector<8x128xf32>
    %158 = arith.mulf %156, %157 : vector<8x128xf32>
    %159 = vector.broadcast %148 : vector<1x128xf32> to vector<8x128xf32>
    %160 = arith.addf %158, %159 : vector<8x128xf32>
    %cst_128 = arith.constant 0.000000e+00 : f32
    %161 = vector.broadcast %cst_128 : f32 to vector<8x128xf32>
    %162 = arith.subf %161, %160 : vector<8x128xf32>
    %163 = math.exp %162 : vector<8x128xf32>
    %cst_129 = arith.constant 1.000000e+00 : f32
    %164 = vector.broadcast %cst_129 : f32 to vector<8x128xf32>
    %165 = arith.addf %164, %163 : vector<8x128xf32>
    %166 = tpu.reciprocal %165 {approx = true} : vector<8x128xf32> -> vector<8x128xf32>
    %c0_130 = arith.constant 0 : index
    %c0_131 = arith.constant 0 : index
    %c0_132 = arith.constant 0 : index
    %167 = vector.load %arg11[%c0_130, %c0_131, %c0_132] : memref<2x8x128xf32, #tpu.memory_space<vmem>>, vector<1x8x128xf32>
    %168 = vector.shape_cast %167 : vector<1x8x128xf32> to vector<8x128xf32>
    %169 = vector.shape_cast %166 : vector<8x128xf32> to vector<1x8x128xf32>
    tpu.vector_store %arg11[%c0_130, %c0_131, %c0_132], %169 {strides = array<i32>} : memref<2x8x128xf32, #tpu.memory_space<vmem>>, vector<1x8x128xf32>,
    %c1_133 = arith.constant 1 : index
    %c0_134 = arith.constant 0 : index
    %c0_135 = arith.constant 0 : index
    %170 = vector.load %arg13[%c1_133, %c0_134, %c0_135] : memref<2x10x40xf32, #tpu.memory_space<vmem>>, vector<1x8x40xf32>
    %171 = vector.shape_cast %170 : vector<1x8x40xf32> to vector<8x40xf32>
    %c1_136 = arith.constant 1 : index
    %c1_137 = arith.constant 1 : index
    %c0_138 = arith.constant 0 : index
    %172 = vector.load %arg13[%c1_136, %c1_137, %c0_138] : memref<2x10x40xf32, #tpu.memory_space<vmem>>, vector<1x8x40xf32>
    %173 = vector.shape_cast %172 : vector<1x8x40xf32> to vector<8x40xf32>
    %c1_139 = arith.constant 1 : index
    %c2_140 = arith.constant 2 : index
    %c0_141 = arith.constant 0 : index
    %174 = vector.load %arg13[%c1_139, %c2_140, %c0_141] : memref<2x10x40xf32, #tpu.memory_space<vmem>>, vector<1x8x40xf32>
    %175 = vector.shape_cast %174 : vector<1x8x40xf32> to vector<8x40xf32>
    %176 = tpu.concatenate %171, %173, %175 in 1 : vector<8x40xf32>, vector<8x40xf32>, vector<8x40xf32> -> vector<8x120xf32>
    %cst_142 = arith.constant dense<0.000000e+00> : vector<8x128xf32>
    %177 = tpu.matmul %176, %146, %cst_142 {dimension_numbers = #tpu.dot_dimension_numbers<[1], [0], [0], [1], [0, 0, 1, 1], [], []>} : vector<8x120xf32>, vector<120x128xf32>, vector<8x128xf32> -> vector<8x128xf32>
    %178 = vector.broadcast %147 : vector<1x128xf32> to vector<8x128xf32>
    %179 = arith.mulf %177, %178 : vector<8x128xf32>
    %180 = vector.broadcast %148 : vector<1x128xf32> to vector<8x128xf32>
    %181 = arith.addf %179, %180 : vector<8x128xf32>
    %cst_143 = arith.constant 0.000000e+00 : f32
    %182 = vector.broadcast %cst_143 : f32 to vector<8x128xf32>
    %183 = arith.subf %182, %181 : vector<8x128xf32>
    %184 = math.exp %183 : vector<8x128xf32>
    %cst_144 = arith.constant 1.000000e+00 : f32
    %185 = vector.broadcast %cst_144 : f32 to vector<8x128xf32>
    %186 = arith.addf %185, %184 : vector<8x128xf32>
    %187 = tpu.reciprocal %186 {approx = true} : vector<8x128xf32> -> vector<8x128xf32>
    %c1_145 = arith.constant 1 : index
    %c0_146 = arith.constant 0 : index
    %c0_147 = arith.constant 0 : index
    %188 = vector.load %arg11[%c1_145, %c0_146, %c0_147] : memref<2x8x128xf32, #tpu.memory_space<vmem>>, vector<1x8x128xf32>
    %189 = vector.shape_cast %188 : vector<1x8x128xf32> to vector<8x128xf32>
    %190 = vector.shape_cast %187 : vector<8x128xf32> to vector<1x8x128xf32>
    tpu.vector_store %arg11[%c1_145, %c0_146, %c0_147], %190 {strides = array<i32>} : memref<2x8x128xf32, #tpu.memory_space<vmem>>, vector<1x8x128xf32>,
    return
  }
}

</mosaic_0001>

<bundles_post_ra>
// kernel: forward.1
= control target key start
LH: loop header
LB: loop body
LE: loop exit
PB: predicated region body
PF: predicated region fallthrough
CT: control target
= control target key end

     0   :  { %16 = vsyncpa [#allocation5], 0  ;;  %s1292_s0 = inlined_call_operand.hbm [shape: f32[2,8], index: 0, kind: input, shape index: {}]   ;;  %s1293_s1 = inlined_call_operand.vmem [shape: f32[8,32], index: 1, kind: input, shape index: {}]   ;;  %s1294_s2 = inlined_call_operand.hbm [shape: f32[1,32], index: 2, kind: input, shape index: {}]   ;;  %s1295_s3 = inlined_call_operand.hbm [shape: f32[32,128], index: 3, kind: input, shape index: {}]   ;;  %s1296_s4 = inlined_call_operand.vmem [shape: f32[1,128], index: 4, kind: input, shape index: {}]   ;;  %s1297_s5 = inlined_call_operand.hbm [shape: f32[144,64], index: 5, kind: input, shape index: {}]   ;;  %s1298_s6 = inlined_call_operand.vmem [shape: f32[1,64], index: 6, kind: input, shape index: {}]   ;;  %s1299_s7 = inlined_call_operand.vmem [shape: f32[1,64], index: 7, kind: input, shape index: {}]   ;;  %s1300_s8 = inlined_call_operand.hbm [shape: f32[120,128], index: 8, kind: input, shape index: {}]   ;;  %s1301_s9 = inlined_call_operand.vmem [shape: f32[1,128], index: 9, kind: input, shape index: {}]   ;;  %s1302_s10 = inlined_call_operand.vmem [shape: f32[1,128], index: 10, kind: input, shape index: {}]   ;;  %s1303_s11 = inlined_call_operand.vmem [shape: f32[2,8,128], index: 11, kind: output, shape index: {}]  }
   0x1   :  { %17 = vsyncpa [#allocation7], 0 }
   0x2   :  { %18 = vsyncpa [#allocation10], 0  ;;  %s1048_s17 = smov [#allocation6]  }
   0x3   :  { %s37_s18 = sshll.u32 %s1048_s17, 4  ;;  %s38_s18 = int_to_ptr.vmem [resolvable:$true] %s37_s18 }
   0x4   :  { %s950_s19 = scalar_lea.vmem %s38_s18, 16  ;;  %s954_s20 = scalar_lea.vmem %s38_s18, 32 }
   0x5   :  { %p951_p0 = scmp.ne.s32.totalorder %s38_s18, %s950_s19  ;;  %p955_p1 = scmp.lt.s32.totalorder %s38_s18, %s38_s18 }
   0x6   :  { %p956_p2 = scmp.lt.s32.totalorder %s954_s20, %s950_s19 }
   0x8   :  { %p957_p3 = por %p956_p2, %p955_p1 }
   0xa   :  { %p958_p4 = pnand %p957_p3, %p951_p0 }
   0xc   :  { %961 = shalt.err (!%p958_p4)
}
   0xd   :  { %40 = dma.hbm_to_vmem [thread:$0]  %s1294_s2, 16, %s38_s18, [#allocation7]  }
   0xe   :  { %s1049_s23 = smov [#allocation9]   ;;  %s1050_s25 = smov [#allocation4]  }
   0xf   :  { %s60_s24 = sshll.u32 %s1049_s23, 4  ;;  %s25_s26 = sshll.u32 %s1050_s25, 4  ;;  %s61_s24 = int_to_ptr.vmem [resolvable:$true] %s60_s24  ;;  %s26_s26 = int_to_ptr.vmem [resolvable:$true] %s25_s26 }
  0x10   :  { %s970_s27 = scalar_lea.vmem %s61_s24, 2304  ;;  %p975_p6 = scmp.lt.s32.totalorder %s61_s24, %s61_s24 }
  0x11   :  { %p971_p5 = scmp.ne.s32.totalorder %s61_s24, %s970_s27  ;;  %p976_p7 = scmp.lt.s32.totalorder %s970_s27, %s970_s27 }
  0x13   :  { %p977_p8 = por %p976_p7, %p975_p6 }
  0x15   :  { %p978_p9 = pnand %p977_p8, %p971_p5 }
  0x17   :  { %981 = shalt.err (!%p978_p9)
}
  0x18   :  { %s1051_s28 = smov 128   ;;  %s1052_s29 = smov 8  }
  0x19   :  { %66 = dma.hbm_to_vmem [thread:$0]  %s1297_s5, 2304, %s61_s24, [#allocation10], %s1051_s28, %s1051_s28, %s1052_s29  }
  0x1a   :  { %s990_s2 = scalar_lea.vmem %s26_s26, 32  ;;  %p995_p11 = scmp.lt.s32.totalorder %s26_s26, %s26_s26 }
  0x1b   :  { %p991_p10 = scmp.ne.s32.totalorder %s26_s26, %s990_s2  ;;  %p996_p12 = scmp.lt.s32.totalorder %s990_s2, %s990_s2 }
  0x1d   :  { %p997_p13 = por %p996_p12, %p995_p11 }
  0x1f   :  { %p998_p0 = pnand %p997_p13, %p991_p10 }
  0x21   :  { %1001 = shalt.err (!%p998_p0)
}
  0x22   :  { %28 = dma.hbm_to_vmem [thread:$0]  %s1292_s0, 32, %s26_s26, [#allocation5]  }
  0x23   :  { %s1053_s15 = smov [#allocation8]   ;;  %s1054_s17 = smov [#allocation11]  }
  0x24   :  { %s46_s16 = sshll.u32 %s1053_s15, 4  ;;  %s76_s18 = sshll.u32 %s1054_s17, 4  ;;  %s47_s16 = int_to_ptr.vmem [resolvable:$true] %s46_s16  ;;  %s77_s18 = int_to_ptr.vmem [resolvable:$true] %s76_s18 }
  0x25   :  { %s1010_s19 = scalar_lea.vmem %s47_s16, 512  ;;  %p1015_p2 = scmp.lt.s32.totalorder %s47_s16, %s47_s16 }
  0x26   :  { %p1011_p1 = scmp.ne.s32.totalorder %s47_s16, %s1010_s19  ;;  %p1016_p3 = scmp.lt.s32.totalorder %s1010_s19, %s1010_s19 }
  0x28   :  { %p1017_p4 = por %p1016_p3, %p1015_p2 }
  0x2a   :  { %p1018_p5 = pnand %p1017_p4, %p1011_p1 }
  0x2c   :  { %1021 = shalt.err (!%p1018_p5)
}
  0x2d   :  { %52 = dma.hbm_to_vmem [thread:$0]  %s1295_s3, 512, %s47_s16, [#allocation7], %s1051_s28, %s1051_s28, %s1052_s29  }
  0x2e   :  { %s1030_s0 = scalar_lea.vmem %s77_s18, 1920  ;;  %p1035_p7 = scmp.lt.s32.totalorder %s77_s18, %s77_s18 }
  0x2f   :  { %p1031_p6 = scmp.ne.s32.totalorder %s77_s18, %s1030_s0  ;;  %p1036_p8 = scmp.lt.s32.totalorder %s1030_s0, %s1030_s0 }
  0x31   :  { %p1037_p9 = por %p1036_p8, %p1035_p7 }
  0x33   :  { %p1038_p10 = pnand %p1037_p9, %p1031_p6 }
  0x35   :  { %1041 = shalt.err (!%p1038_p10)
}
  0x36   :  { %82 = dma.hbm_to_vmem [thread:$0]  %s1300_s8, 1920, %s77_s18, [#allocation10], %s1051_s28, %s1051_s28, %s1052_s29  }
  0x37   :  { %1042 = dma.done.wait [#allocation5], 32  }
  0x38   :  { %1043 = vsyncadd [#allocation5], 4294967264 }
  0x39   :  { %1044 = dma.done.wait [#allocation7], 528  }
  0x3a   :  { %1045 = vsyncadd [#allocation7], 4294966768 }
  0x3b   :  { %1046 = dma.done.wait [#allocation10], 4224  }
  0x3c   :  { %1047 = vsyncadd [#allocation10], 4294963072  ;;  %v1055_v0 = vmov 0.0   ;;  %vm1056_vm0 = vmmov 0   ;;  %vm120_vm1 = vcmask 64512   ;;  %v112_v1 = vld [vmem:[%s1293_s1] sm:$0xff] }
  0x3d   :  { %830 = vmatprep.subr.mxu0 %v1055_v0  ;;  %832 = vmatprep.mubr.msk.f32.mxu0 %vm1056_vm0, %v1055_v0  ;;  %v111_v2 = vld [vmem:[#allocation4] sm:$0x3]  ;;  %v197_v4 = vld [vmem:[#allocation8 + $0x10] sm:$0xff]  ;;  %v196_v5 = vld [vmem:[#allocation8 + $0x8] sm:$0xff]  ;;  %vm206_vm2 = vcmask 261120   ;;  %vm102_vm3 = vcmask 390144  }
  0x3e   :  { %835 = vmatprep.subr.mxu1 %v1055_v0  ;;  %843 = vmatprep.mubr.msk.f32.mxu1 %vm1056_vm0, %v1055_v0  ;;  %v198_v3 = vld [vmem:[#allocation8 + $0x18] sm:$0xff]  ;;  %v195_v6 = vld [vmem:[#allocation8] sm:$0xff]  ;;  %103 = vst.msk [vmem:[#allocation2] sm:$0x3f] %vm102_vm3, %v1055_v0  ;;  %104 = vst.msk [vmem:[#allocation2 + $0x8] sm:$0x3f] %vm102_vm3, %v1055_v0 }
  0x3f   :  { %831 = vmatpush3.msra.mxu0 %v112_v1  ;;  %836 = vmatpush3.msra.mxu1 %v198_v3  ;;  %v778_v7 = vld [vmem:[#allocation6] ss:$0 sm:$0xff]  ;;  %v780_v12 = vld [vmem:[%s1296_s4] ss:$0 sm:$0xff]  ;;  %s1057_s24 = smov 72   ;;  %s1058_s25 = smov 40  }
  0x40   :  { %833 = vmatmul.mubr.msk.f32.vlgmr.msra.gmra.mxu0 %vm120_vm1, %v111_v2  ;;  %837 = vmatprep.subr.mxu1 %v1055_v0  ;;  %s1059_s26 = smov 104   ;;  %v320_v17 = vld [vmem:[#allocation9 + $0x78] sm:$0xff]  ;;  %v319_v18 = vld [vmem:[#allocation9 + $0x70] sm:$0xff]  ;;  %v318_v19 = vld [vmem:[#allocation9 + $0x68] sm:$0xff]  ;;  %vm285_vm4 = vcmask 319552   ;;  %vm300_vm5 = vcmask 320577  }
  0x41   :  { %343 = vmatprep.subr.mxu0 %v1055_v0  ;;  %838 = vmatpush3.msra.mxu1 %v197_v4  ;;  %v317_v20 = vld [vmem:[#allocation9 + $0x60] sm:$0xff]  ;;  %v316_v21 = vld [vmem:[#allocation9 + $0x58] sm:$0xff]  ;;  %v315_v22 = vld [vmem:[#allocation9 + $0x50] sm:$0xff]  ;;  %s1060_s4 = smov 96   ;;  %s1061_s27 = smov 48   ;;  %vm340_vm6 = vcmask 130048  }
  0x42   :  { %839 = vmatprep.subr.mxu1 %v1055_v0  ;;  %344 = vmatpush1.msra.mxu0 %v320_v17  ;;  %v314_v23 = vld [vmem:[#allocation9 + $0x48] sm:$0xff]  ;;  %v313_v24 = vld [vmem:[#allocation9 + $0x40] sm:$0xff]  ;;  %v312_v25 = vld [vmem:[#allocation9 + $0x38] sm:$0xff]  ;;  %vm336_vm7 = vcmask 392192   ;;  %vm338_vm8 = vcmask 785408   ;;  %vm105_vm9 = vcmask 326656  }
  0x43   :  { %840 = vmatpush3.msra.mxu1 %v196_v5  ;;  %345 = vmatprep.subr.mxu0 %v1055_v0  ;;  %v311_v26 = vld [vmem:[#allocation9 + $0x30] sm:$0xff]  ;;  %v310_v27 = vld [vmem:[#allocation9 + $0x28] sm:$0xff]  ;;  %v309_v28 = vld [vmem:[#allocation9 + $0x20] sm:$0xff]  ;;  %vm107_vm10 = vcmask 320512   ;;  %106 = vst.msk [vmem:[#allocation3] sm:$0xff] %vm105_vm9, %v1055_v0  ;;  %s1062_s2 = smov 100  }
  0x44   :  { %841 = vmatprep.subr.mxu1 %v1055_v0  ;;  %346 = vmatpush1.msra.mxu0 %v319_v18  ;;  %v308_v29 = vld [vmem:[#allocation9 + $0x18] sm:$0xff]  ;;  %v307_v30 = vld [vmem:[#allocation9 + $0x10] sm:$0xff]  ;;  %v306_v31 = vld [vmem:[#allocation9 + $0x8] sm:$0xff]  ;;  %108 = vst.msk [vmem:[#allocation3 + $0x8] sm:$0x3] %vm107_vm10, %v1055_v0  ;;  %s1063_s13 = smov 4  }
  0x45   :  { %842 = vmatpush3.msra.mxu1 %v195_v6  ;;  %347 = vmatprep.subr.mxu0 %v1055_v0  ;;  %v305_v34 = vld [vmem:[#allocation9] sm:$0xff]  ;;  %v322_v35 = vld [vmem:[#allocation9 + $0x88] sm:$0xff]  ;;  %109 = vst.msk [vmem:[#allocation3 + $0x10] sm:$0xff] %vm105_vm9, %v1055_v0  ;;  %v564_v5 = vld [vmem:[#allocation11 + $0x68] sm:$0xff]  ;;  %vm432_vm11 = vcmask 286752   ;;  %vm438_vm12 = vcmask 287777  }
  0x46   :  { %462 = vmatprep.subr.mxu1 %v1055_v0  ;;  %348 = vmatpush1.msra.mxu0 %v318_v19  ;;  %v321_v36 = vld [vmem:[#allocation9 + $0x80] sm:$0xff]  ;;  %110 = vst.msk [vmem:[#allocation3 + $0x18] sm:$0x3] %vm107_vm10, %v1055_v0  ;;  %v783_v55 = vld [vmem:[%s1298_s6] ss:$0 sm:$0xff]  ;;  %v563_v6 = vld [vmem:[#allocation11 + $0x60] sm:$0xff] }
  0x47   :  { %349 = vmatprep.subr.mxu0 %v1055_v0  ;;  %v784_v56 = vld [vmem:[%s1299_s7] ss:$0 sm:$0xff]  ;;  %v565_v4 = vld [vmem:[#allocation11 + $0x70] sm:$0xff]  ;;  %vm441_vm13 = vcmask 288802   ;;  %vm444_vm14 = vcmask 289827   ;;  %s1064_s6 = smov 80  }
  0x48   :  { %350 = vmatpush1.msra.mxu0 %v317_v20  ;;  %vm580_vm15 = vcmask 654336  }
  0x49   :  { %351 = vmatprep.subr.mxu0 %v1055_v0 }
  0x4a   :  { %352 = vmatpush1.msra.mxu0 %v316_v21 }
  0x4b   :  { %353 = vmatprep.subr.mxu0 %v1055_v0 }
  0x4c   :  { %354 = vmatpush1.msra.mxu0 %v315_v22 }
  0x4d   :  { %355 = vmatprep.subr.mxu0 %v1055_v0 }
  0x4e   :  { %356 = vmatpush1.msra.mxu0 %v314_v23 }
  0x4f   :  { %357 = vmatprep.subr.mxu0 %v1055_v0 }
  0x50   :  { %358 = vmatpush1.msra.mxu0 %v313_v24 }
  0x51   :  { %359 = vmatprep.subr.mxu0 %v1055_v0 }
  0x52   :  { %360 = vmatpush1.msra.mxu0 %v312_v25 }
  0x53   :  { %361 = vmatprep.subr.mxu0 %v1055_v0 }
  0x54   :  { %362 = vmatpush1.msra.mxu0 %v311_v26 }
  0x55   :  { %363 = vmatprep.subr.mxu0 %v1055_v0 }
  0x56   :  { %364 = vmatpush1.msra.mxu0 %v310_v27 }
  0x57   :  { %365 = vmatprep.subr.mxu0 %v1055_v0 }
  0x58   :  { %366 = vmatpush1.msra.mxu0 %v309_v28 }
  0x59   :  { %367 = vmatprep.subr.mxu0 %v1055_v0 }
  0x5a   :  { %368 = vmatpush1.msra.mxu0 %v308_v29 }
  0x5b   :  { %369 = vmatprep.subr.mxu0 %v1055_v0 }
  0x5c   :  { %370 = vmatpush1.msra.mxu0 %v307_v30 }
  0x5d   :  { %371 = vmatprep.subr.mxu0 %v1055_v0 }
  0x5e   :  { %372 = vmatpush1.msra.mxu0 %v306_v31 }
  0x5f   :  { %373 = vmatprep.subr.mxu0 %v1055_v0 }
  0x60   :  { %374 = vmatpush1.msra.mxu0 %v305_v34 }
  0x61   :  { %403 = vmatprep.subr.mxu0 %v1055_v0 }
  0x62   :  { %404 = vmatpush2.msra.mxu0 %v322_v35 }
  0x63   :  { %405 = vmatprep.subr.mxu0 %v1055_v0 }
  0x64   :  { %406 = vmatpush2.msra.mxu0 %v321_v36 }
  0x65   :  { %846 = vmatprep.subr.mxu0 %v1055_v0 }
 0x100   :  { %v190_v8 = vpop.f32.mrf.mxu0 }
 0x101   :  { %v191_v9 = vadd.f32 %v778_v7, %v190_v8  ;;  %v562_v7 = vld [vmem:[#allocation11 + $0x58] sm:$0xff]  ;;  %v561_v8 = vld [vmem:[#allocation11 + $0x50] sm:$0xff] }
 0x102   :  { %v834_v10 = vpop.f32.mrf.mxu0 }
 0x103   :  { %v194_v11 = vmax.f32 %v191_v9, 0.0  ;;  %v560_v9 = vld [vmem:[#allocation11 + $0x48] sm:$0xff]  ;;  %v559_v10 = vld [vmem:[#allocation11 + $0x40] sm:$0xff] }
 0x105   :  { %844 = vmatmul.mubr.msk.f32.vlgmr.msra.gmra.mxu1 %vm206_vm2, %v194_v11  ;;  %v558_v11 = vld [vmem:[#allocation11 + $0x38] sm:$0xff] }
 0x106   :  { %463 = vmatpush1.msra.mxu1 %v320_v17  ;;  %v552_v17 = vld [vmem:[#allocation11 + $0x8] sm:$0xff] }
 0x107   :  { %464 = vmatprep.subr.mxu1 %v1055_v0 }
 0x108   :  { %465 = vmatpush1.msra.mxu1 %v319_v18 }
 0x109   :  { %466 = vmatprep.subr.mxu1 %v1055_v0 }
 0x10a   :  { %467 = vmatpush1.msra.mxu1 %v318_v19 }
 0x10b   :  { %468 = vmatprep.subr.mxu1 %v1055_v0 }
 0x10c   :  { %469 = vmatpush1.msra.mxu1 %v317_v20  ;;  %v551_v20 = vld [vmem:[#allocation11] sm:$0xff] }
 0x10d   :  { %470 = vmatprep.subr.mxu1 %v1055_v0 }
 0x10e   :  { %471 = vmatpush1.msra.mxu1 %v316_v21 }
 0x10f   :  { %472 = vmatprep.subr.mxu1 %v1055_v0 }
 0x110   :  { %473 = vmatpush1.msra.mxu1 %v315_v22 }
 0x111   :  { %474 = vmatprep.subr.mxu1 %v1055_v0 }
 0x112   :  { %475 = vmatpush1.msra.mxu1 %v314_v23 }
 0x113   :  { %476 = vmatprep.subr.mxu1 %v1055_v0 }
 0x114   :  { %477 = vmatpush1.msra.mxu1 %v313_v24 }
 0x115   :  { %478 = vmatprep.subr.mxu1 %v1055_v0 }
 0x116   :  { %479 = vmatpush1.msra.mxu1 %v312_v25 }
 0x117   :  { %480 = vmatprep.subr.mxu1 %v1055_v0 }
 0x118   :  { %481 = vmatpush1.msra.mxu1 %v311_v26 }
 0x119   :  { %482 = vmatprep.subr.mxu1 %v1055_v0 }
 0x11a   :  { %483 = vmatpush1.msra.mxu1 %v310_v27 }
 0x11b   :  { %484 = vmatprep.subr.mxu1 %v1055_v0 }
 0x11c   :  { %485 = vmatpush1.msra.mxu1 %v309_v28 }
 0x11d   :  { %486 = vmatprep.subr.mxu1 %v1055_v0 }
 0x11e   :  { %487 = vmatpush1.msra.mxu1 %v308_v29 }
 0x11f   :  { %488 = vmatprep.subr.mxu1 %v1055_v0 }
 0x120   :  { %489 = vmatpush1.msra.mxu1 %v307_v30 }
 0x121   :  { %490 = vmatprep.subr.mxu1 %v1055_v0 }
 0x122   :  { %491 = vmatpush1.msra.mxu1 %v306_v31 }
 0x123   :  { %492 = vmatprep.subr.mxu1 %v1055_v0 }
 0x124   :  { %493 = vmatpush1.msra.mxu1 %v305_v34 }
 0x125   :  { %522 = vmatprep.subr.mxu1 %v1055_v0 }
 0x126   :  { %523 = vmatpush2.msra.mxu1 %v322_v35 }
 0x127   :  { %524 = vmatprep.subr.mxu1 %v1055_v0 }
 0x128   :  { %525 = vmatpush2.msra.mxu1 %v321_v36  ;;  %v787_v36 = vld [vmem:[%s1301_s9] ss:$0 sm:$0xff] }
 0x129   :  { %879 = vmatprep.subr.mxu1 %v1055_v0 }
 0x1c5   :  { %v276_v13 = vpop.f32.mrf.mxu1 }
 0x1c6   :  { %v277_v14 = vadd.f32 %v780_v12, %v276_v13  ;;  %v557_v12 = vld [vmem:[#allocation11 + $0x30] sm:$0xff]  ;;  %v556_v13 = vld [vmem:[#allocation11 + $0x28] sm:$0xff] }
 0x1c7   :  { %v845_v15 = vpop.f32.mrf.mxu1 }
 0x1c8   :  { %v280_v16 = vmax.f32 %v277_v14, 0.0  ;;  %v555_v14 = vld [vmem:[#allocation11 + $0x20] sm:$0xff]  ;;  %v554_v15 = vld [vmem:[#allocation11 + $0x18] sm:$0xff] }
 0x1ca   :  { %291 = vrot.lane.b32.xlu1 %v280_v16, %s1057_s24  ;;  %282 = vrot.lane.b32.xlu0 %v280_v16, %s1052_s29 }
 0x1ce   :  { %295 = vrot.lane.b32.xlu1 %v280_v16, %s1058_s25  ;;  %287 = vrot.lane.b32.xlu0 %v280_v16, %s1059_s26  ;;  %v553_v16 = vld [vmem:[#allocation11 + $0x10] sm:$0xff] }
 0x23c   :  { %v292_v32 = vpop.permute.xlu1 %291  ;;  %v283_v33 = vpop.permute.xlu0 %282 }
 0x23d   :  { %294 = vst.msk [vmem:[#allocation2 + $0x3] sm:$0x1] %vm285_vm4, %v292_v32  ;;  %286 = vst.msk [vmem:[#allocation2 + $0x1] sm:$0x1] %vm285_vm4, %v283_v33 }
 0x23e   :  { %303 = vst.msk [vmem:[#allocation2 + $0xa] sm:$0x2] %vm300_vm5, %v292_v32  ;;  %301 = vst.msk [vmem:[#allocation2 + $0x8] sm:$0x2] %vm300_vm5, %v283_v33 }
 0x240   :  { %v296_v37 = vpop.permute.xlu1 %295  ;;  %v288_v38 = vpop.permute.xlu0 %287 }
 0x241   :  { %298 = vst.msk [vmem:[#allocation2 + $0x4] sm:$0x1] %vm285_vm4, %v296_v37  ;;  %290 = vst.msk [vmem:[#allocation2 + $0x2] sm:$0x1] %vm285_vm4, %v288_v38 }
 0x242   :  { %304 = vst.msk [vmem:[#allocation2 + $0xb] sm:$0x2] %vm300_vm5, %v296_v37  ;;  %302 = vst.msk [vmem:[#allocation2 + $0x9] sm:$0x2] %vm300_vm5, %v288_v38  ;;  %v788_v37 = vld [vmem:[%s1302_s10] ss:$0 sm:$0xff] }
 0x248   :  { %v327_v39 = vld [vmem:[#allocation2 + $0x2] sm:$0xf] }
 0x249   :  { %v326_v40 = vld [vmem:[#allocation2 + $0x1] sm:$0xf]  ;;  %v448_v41 = vld [vmem:[#allocation2 + $0x9] sm:$0xf]  ;;  %333 = vrot.lane.b32.xlu1 %v327_v39, %s1060_s4 }
 0x24a   :  { %v929_v42 = vpack.i.bf16 %v448_v41, %v326_v40  ;;  %v449_v43 = vld [vmem:[#allocation2 + $0xa] sm:$0xf]  ;;  %v325_v49 = vld [vmem:[#allocation2] sm:$0xf] }
 0x24b   :  { %v447_v48 = vld [vmem:[#allocation2 + $0x8] sm:$0xf] }
 0x24c   :  { %930 = vrot.lane.b32.xlu0 %v929_v42, %s1061_s27 }
 0x250   :  { %455 = vrot.lane.b32.xlu0 %v449_v43, %s1060_s4 }
 0x2bb   :  { %v334_v44 = vpop.permute.xlu1 %333 }
 0x2bc   :  { %782 = vmatprep.mubr.msk.f32.mxu0 %vm340_vm6, %v334_v44 }
 0x2be   :  { %v931_v45 = vpop.permute.xlu0 %930 }
 0x2bf   :  { %v933_v46 = vunpack.i.h.bf16 %v931_v45  ;;  %v932_v47 = vunpack.i.l.bf16 %v931_v45 }
 0x2c1   :  { %v458_v50 = vsel %vm336_vm7, %v447_v48, %v933_v46  ;;  %v337_v51 = vsel %vm336_vm7, %v325_v49, %v932_v47 }
 0x2c2   :  { %v456_v52 = vpop.permute.xlu0 %455  ;;  %v339_v53 = vsel %vm338_vm8, %v337_v51, %v334_v44 }
 0x2c3   :  { %v459_v54 = vsel %vm338_vm8, %v458_v50, %v456_v52  ;;  %408 = vmatmul.mubr.f32.vlgmr.msra.gmra.mxu0 %v339_v53  ;;  %785 = vmatprep.mubr.msk.f32.mxu1 %vm340_vm6, %v456_v52 }
 0x2c4   :  { %527 = vmatmul.mubr.f32.vlgmr.msra.gmra.mxu1 %v459_v54  ;;  %876 = vmatprep.mubr.msk.f32.mxu0 %vm1056_vm0, %v1055_v0 }
 0x2c5   :  { %909 = vmatprep.mubr.msk.f32.mxu1 %vm1056_vm0, %v1055_v0  ;;  %847 = vmatpush3.msra.mxu0 %v565_v4  ;;  %vm582_vm0 = vcmask 982016  }
 0x2c6   :  { %880 = vmatpush3.msra.mxu1 %v565_v4  ;;  %848 = vmatprep.subr.mxu0 %v1055_v0 }
 0x2c7   :  { %881 = vmatprep.subr.mxu1 %v1055_v0  ;;  %849 = vmatpush3.msra.mxu0 %v564_v5 }
 0x2c8   :  { %882 = vmatpush3.msra.mxu1 %v564_v5  ;;  %850 = vmatprep.subr.mxu0 %v1055_v0 }
 0x2c9   :  { %883 = vmatprep.subr.mxu1 %v1055_v0  ;;  %851 = vmatpush3.msra.mxu0 %v563_v6 }
 0x2ca   :  { %884 = vmatpush3.msra.mxu1 %v563_v6  ;;  %852 = vmatprep.subr.mxu0 %v1055_v0 }
 0x2cb   :  { %885 = vmatprep.subr.mxu1 %v1055_v0  ;;  %853 = vmatpush3.msra.mxu0 %v562_v7 }
 0x2cc   :  { %886 = vmatpush3.msra.mxu1 %v562_v7  ;;  %854 = vmatprep.subr.mxu0 %v1055_v0 }
 0x2cd   :  { %887 = vmatprep.subr.mxu1 %v1055_v0  ;;  %855 = vmatpush3.msra.mxu0 %v561_v8 }
 0x2ce   :  { %888 = vmatpush3.msra.mxu1 %v561_v8  ;;  %856 = vmatprep.subr.mxu0 %v1055_v0 }
 0x2cf   :  { %889 = vmatprep.subr.mxu1 %v1055_v0  ;;  %857 = vmatpush3.msra.mxu0 %v560_v9 }
 0x2d0   :  { %890 = vmatpush3.msra.mxu1 %v560_v9  ;;  %858 = vmatprep.subr.mxu0 %v1055_v0 }
 0x2d1   :  { %891 = vmatprep.subr.mxu1 %v1055_v0  ;;  %859 = vmatpush3.msra.mxu0 %v559_v10 }
 0x2d2   :  { %892 = vmatpush3.msra.mxu1 %v559_v10  ;;  %860 = vmatprep.subr.mxu0 %v1055_v0 }
 0x2d3   :  { %893 = vmatprep.subr.mxu1 %v1055_v0  ;;  %861 = vmatpush3.msra.mxu0 %v558_v11 }
 0x2d4   :  { %894 = vmatpush3.msra.mxu1 %v558_v11  ;;  %862 = vmatprep.subr.mxu0 %v1055_v0 }
 0x2d5   :  { %895 = vmatprep.subr.mxu1 %v1055_v0  ;;  %863 = vmatpush3.msra.mxu0 %v557_v12 }
 0x2d6   :  { %896 = vmatpush3.msra.mxu1 %v557_v12  ;;  %864 = vmatprep.subr.mxu0 %v1055_v0 }
 0x2d7   :  { %897 = vmatprep.subr.mxu1 %v1055_v0  ;;  %865 = vmatpush3.msra.mxu0 %v556_v13 }
 0x2d8   :  { %898 = vmatpush3.msra.mxu1 %v556_v13  ;;  %866 = vmatprep.subr.mxu0 %v1055_v0 }
 0x2d9   :  { %899 = vmatprep.subr.mxu1 %v1055_v0  ;;  %867 = vmatpush3.msra.mxu0 %v555_v14 }
 0x2da   :  { %900 = vmatpush3.msra.mxu1 %v555_v14  ;;  %868 = vmatprep.subr.mxu0 %v1055_v0 }
 0x2db   :  { %901 = vmatprep.subr.mxu1 %v1055_v0  ;;  %869 = vmatpush3.msra.mxu0 %v554_v15 }
 0x2dc   :  { %902 = vmatpush3.msra.mxu1 %v554_v15  ;;  %870 = vmatprep.subr.mxu0 %v1055_v0 }
 0x2dd   :  { %903 = vmatprep.subr.mxu1 %v1055_v0  ;;  %871 = vmatpush3.msra.mxu0 %v553_v16 }
 0x2de   :  { %904 = vmatpush3.msra.mxu1 %v553_v16  ;;  %872 = vmatprep.subr.mxu0 %v1055_v0 }
 0x2df   :  { %905 = vmatprep.subr.mxu1 %v1055_v0  ;;  %873 = vmatpush3.msra.mxu0 %v552_v17 }
 0x2e0   :  { %906 = vmatpush3.msra.mxu1 %v552_v17  ;;  %874 = vmatprep.subr.mxu0 %v1055_v0 }
 0x2e1   :  { %907 = vmatprep.subr.mxu1 %v1055_v0  ;;  %875 = vmatpush3.msra.mxu0 %v551_v20 }
 0x2e2   :  { %908 = vmatpush3.msra.mxu1 %v551_v20 }
 0x383   :  { %v409_v57 = vpop.f32.mrf.mxu0 }
 0x384   :  { %v419_v58 = vmul.f32 %v783_v55, %v409_v57  ;;  %v528_v59 = vpop.f32.mrf.mxu1 }
 0x385   :  { %v532_v60 = vmul.f32 %v783_v55, %v528_v59  ;;  %v411_v61 = vpop.f32.mrf.mxu0 }
 0x386   :  { %v426_v62 = vadd.f32 %v784_v56, %v419_v58  ;;  %v530_v63 = vpop.f32.mrf.mxu1 }
 0x387   :  { %v533_v2 = vadd.f32 %v784_v56, %v532_v60 }
 0x388   :  { %v427_v1 = vmax.f32 %v426_v62, 0.0 }
 0x389   :  { %v534_v3 = vmax.f32 %v533_v2, 0.0 }
 0x38a   :  { %434 = vrot.lane.b32.xlu0 %v427_v1, %s1062_s2  ;;  %429 = vrot.lane.b32.xlu1 %v427_v1, %s1063_s13 }
 0x38e   :  { %541 = vrot.lane.b32.xlu0 %v534_v3, %s1062_s2  ;;  %536 = vrot.lane.b32.xlu1 %v534_v3, %s1063_s13 }
 0x3fc   :  { %v435_v18 = vpop.permute.xlu0 %434  ;;  %v430_v19 = vpop.permute.xlu1 %429 }
 0x3fd   :  { %437 = vst.msk [vmem:[#allocation3 + $0x2] sm:$0x1] %vm432_vm11, %v435_v18  ;;  %433 = vst.msk [vmem:[#allocation3 + $0x1] sm:$0x1] %vm432_vm11, %v430_v19 }
 0x3fe   :  { %440 = vst.msk [vmem:[#allocation3 + $0x3] sm:$0x2] %vm438_vm12, %v435_v18  ;;  %439 = vst.msk [vmem:[#allocation3 + $0x2] sm:$0x2] %vm438_vm12, %v430_v19 }
 0x3ff   :  { %443 = vst.msk [vmem:[#allocation3 + $0x4] sm:$0x4] %vm441_vm13, %v435_v18  ;;  %442 = vst.msk [vmem:[#allocation3 + $0x3] sm:$0x4] %vm441_vm13, %v430_v19 }
 0x400   :  { %446 = vst.msk [vmem:[#allocation3 + $0x5] sm:$0x8] %vm444_vm14, %v435_v18  ;;  %445 = vst.msk [vmem:[#allocation3 + $0x4] sm:$0x8] %vm444_vm14, %v430_v19  ;;  %v542_v21 = vpop.permute.xlu0 %541  ;;  %v537_v0 = vpop.permute.xlu1 %536 }
 0x401   :  { %544 = vst.msk [vmem:[#allocation3 + $0x12] sm:$0x1] %vm432_vm11, %v542_v21  ;;  %540 = vst.msk [vmem:[#allocation3 + $0x11] sm:$0x1] %vm432_vm11, %v537_v0 }
 0x402   :  { %546 = vst.msk [vmem:[#allocation3 + $0x13] sm:$0x2] %vm438_vm12, %v542_v21  ;;  %545 = vst.msk [vmem:[#allocation3 + $0x12] sm:$0x2] %vm438_vm12, %v537_v0 }
 0x403   :  { %548 = vst.msk [vmem:[#allocation3 + $0x14] sm:$0x4] %vm441_vm13, %v542_v21  ;;  %547 = vst.msk [vmem:[#allocation3 + $0x13] sm:$0x4] %vm441_vm13, %v537_v0 }
 0x404   :  { %550 = vst.msk [vmem:[#allocation3 + $0x15] sm:$0x8] %vm444_vm14, %v542_v21  ;;  %549 = vst.msk [vmem:[#allocation3 + $0x14] sm:$0x8] %vm444_vm14, %v537_v0 }
 0x407   :  { %v569_v22 = vld [vmem:[#allocation3 + $0x1] sm:$0xff] }
 0x408   :  { %572 = vrot.lane.b32.xlu1 %v569_v22, %s1058_s25  ;;  %v570_v23 = vld [vmem:[#allocation3 + $0x2] sm:$0xff] }
 0x409   :  { %v568_v27 = vld [vmem:[#allocation3] sm:$0xff] }
 0x40b   :  { %v677_v24 = vld [vmem:[#allocation3 + $0x11] sm:$0xff] }
 0x40c   :  { %576 = vrot.lane.b32.xlu1 %v570_v23, %s1064_s6  ;;  %680 = vrot.lane.b32.xlu0 %v677_v24, %s1058_s25  ;;  %v678_v25 = vld [vmem:[#allocation3 + $0x12] sm:$0xff] }
 0x40d   :  { %v676_v32 = vld [vmem:[#allocation3 + $0x10] sm:$0xff] }
 0x410   :  { %684 = vrot.lane.b32.xlu0 %v678_v25, %s1064_s6 }
 0x47a   :  { %v573_v26 = vpop.permute.xlu1 %572 }
 0x47b   :  { %v579_v28 = vsel %vm105_vm9, %v568_v27, %v573_v26 }
 0x47e   :  { %v681_v29 = vpop.permute.xlu0 %680  ;;  %v577_v30 = vpop.permute.xlu1 %576 }
 0x47f   :  { %v581_v31 = vsel %vm580_vm15, %v579_v28, %v577_v30  ;;  %v687_v33 = vsel %vm105_vm9, %v676_v32, %v681_v29 }
 0x480   :  { %877 = vmatmul.mubr.msk.f32.vlgmr.msra.gmra.mxu0 %vm582_vm0, %v581_v31 }
 0x482   :  { %v685_v34 = vpop.permute.xlu0 %684 }
 0x483   :  { %v688_v35 = vsel %vm580_vm15, %v687_v33, %v685_v34 }
 0x484   :  { %910 = vmatmul.mubr.msk.f32.vlgmr.msra.gmra.mxu1 %vm582_vm0, %v688_v35 }
 0x540   :  { %v652_v38 = vpop.f32.mrf.mxu0 }
 0x541   :  { %v662_v39 = vmul.f32 %v787_v36, %v652_v38 }
 0x542   :  { %v878_v40 = vpop.f32.mrf.mxu0 }
 0x543   :  { %v669_v41 = vadd.f32 %v788_v37, %v662_v39 }
 0x544   :  { %v758_v42 = vpop.f32.mrf.mxu1 }
 0x545   :  { %v670_v43 = vsub.f32 0.0, %v669_v41  ;;  %v762_v44 = vmul.f32 %v787_v36, %v758_v42 }
 0x546   :  { %v911_v45 = vpop.f32.mrf.mxu1 }
 0x547   :  { %v671_v46 = vmul.f32 1.442695, %v670_v43  ;;  %v763_v47 = vadd.f32 %v788_v37, %v762_v44 }
 0x549   :  { %934 = vpow2.f32 %v671_v46  ;;  %v764_v48 = vsub.f32 0.0, %v763_v47 }
 0x54b   :  { %v765_v49 = vmul.f32 1.442695, %v764_v48 }
 0x54d   :  { %936 = vpow2.f32 %v765_v49 }
 0x556   :  { %v935_v50 = vpop.eup %934 }
 0x557   :  { %v673_v51 = vadd.f32 1.0, %v935_v50 }
 0x559   :  { %938 = vrcp.f32 %v673_v51 }
 0x55a   :  { %v937_v52 = vpop.eup %936 }
 0x55b   :  { %v767_v53 = vadd.f32 1.0, %v937_v52 }
 0x55d   :  { %940 = vrcp.f32 %v767_v53 }
 0x566   :  { %v939_v54 = vpop.eup %938 }
 0x567   :  { %675 = vst [vmem:[%s1303_s11] sm:$0xff] %v939_v54 }
 0x56a   :  { %v941_v55 = vpop.eup %940 }
 0x56b   :  { %790 = vst [vmem:[%s1303_s11 + $0x8] sm:$0xff] %v941_v55 }
 0x56c   :  { %775 = vsyncpa [#allocation5], 1 }
 0x56d   :  { %776 = vsyncpa [#allocation7], 1 }
 0x56e   :  { %777 = vsyncpa [#allocation10], 1 }

</bundles_post_ra>
